<compile_context>
chip_gen: v5e
topology: v5e:2x2
jax: 0.10.0
libtpu: 0.0.40
codegen_flags: <defaults>
</compile_context>

<pallas_src>
import functools

import jax
import jax.numpy as jnp
from jax import lax
from jax.experimental import pallas as pl
from jax.experimental.pallas import tpu as pltpu

TEMPERATURE = 0.1
BASE_TEMPERATURE = 0.1          # unused in forward (matches the PyTorch module)
_NORM_EPS = 1e-12               # F.normalize default eps
_NEG_BIG = -1e30                # finite "minus infinity" for masking / init
_VMEM_LIMIT = 48 * 1024 * 1024  # explicit scoped-VMEM limit, < v7x 64 MiB physical


def _round_up(x, m):
    return (x + m - 1) // m * m


# ---------------------------------------------------------------------------
# Stage 1 (fused): normalize z1 & z2, fold 1/T into z1, cast to MXU dtype,
# and compute the diagonal term — one launch, rows touched exactly once.
# ---------------------------------------------------------------------------
def _prep_kernel(z1_ref, z2_ref, z1s_ref, z2n_ref, diag_ref, *, inv_t):
    z1 = z1_ref[...].astype(jnp.float32)
    z2 = z2_ref[...].astype(jnp.float32)
    eps2 = jnp.float32(_NORM_EPS * _NORM_EPS)
    # x / max(||x||, eps) == x * rsqrt(max(sumsq, eps^2)); rsqrt runs on the EUP.
    inv1 = lax.rsqrt(jnp.maximum(jnp.sum(z1 * z1, axis=1, keepdims=True), eps2))
    inv2 = lax.rsqrt(jnp.maximum(jnp.sum(z2 * z2, axis=1, keepdims=True), eps2))
    z1s = (z1 * (inv1 * jnp.float32(inv_t))).astype(z1s_ref.dtype)  # 1/T folded in
    z2n = (z2 * inv2).astype(z2n_ref.dtype)
    z1s_ref[...] = z1s
    z2n_ref[...] = z2n
    # Diagonal from the SAME (possibly bf16-rounded) values that feed the MXU,
    # accumulated in f32 -> matches sim[i, i] of stage 2 to ~ulp level.
    diag_ref[...] = jnp.sum(z1s.astype(jnp.float32) * z2n.astype(jnp.float32),
                            axis=1, keepdims=True)


def _prep(z1p, z2p, *, inv_t, tile, out_dtype):
    bp, dp = z1p.shape
    return pl.pallas_call(
        functools.partial(_prep_kernel, inv_t=inv_t),
        out_shape=(jax.ShapeDtypeStruct((bp, dp), out_dtype),
                   jax.ShapeDtypeStruct((bp, dp), out_dtype),
                   jax.ShapeDtypeStruct((bp, 1), jnp.float32)),
        grid_spec=pltpu.PrefetchScalarGridSpec(
            num_scalar_prefetch=0,
            grid=(bp // tile,),
            in_specs=[pl.BlockSpec((tile, dp), lambda i: (i, 0)),
                      pl.BlockSpec((tile, dp), lambda i: (i, 0))],
            out_specs=[pl.BlockSpec((tile, dp), lambda i: (i, 0)),
                       pl.BlockSpec((tile, dp), lambda i: (i, 0)),
                       pl.BlockSpec((tile, 1), lambda i: (i, 0))],
        ),
        compiler_params=pltpu.CompilerParams(
            dimension_semantics=("parallel",),
            vmem_limit_bytes=_VMEM_LIMIT,
        ),
    )(z1p, z2p)


# ---------------------------------------------------------------------------
# Stage 2: tiled similarity + online (flash-style) logsumexp -> per-row lse
# ---------------------------------------------------------------------------
def _lse_kernel(*refs, use_bias):
    if use_bias:
        z1s_ref, z2k_ref, bias_ref, out_ref, m_scr, l_scr = refs
    else:
        z1s_ref, z2k_ref, out_ref, m_scr, l_scr = refs
        bias_ref = None
    k = pl.program_id(1)

    @pl.when(k == 0)
    def _init():
        m_scr[...] = jnp.full(m_scr.shape, _NEG_BIG, dtype=jnp.float32)
        l_scr[...] = jnp.zeros(l_scr.shape, dtype=jnp.float32)

    # "NT" matmul: contract dim 1 of both operands -> (TQ, TK), no transpose.
    # Operands arrive already in the MXU dtype (bf16 by default); f32 accumulate.
    s = lax.dot_general(z1s_ref[...], z2k_ref[...],
                        dimension_numbers=(((1,), (1,)), ((), ())),
                        preferred_element_type=jnp.float32)
    if use_bias:
        s = s + bias_ref[...]          # (1, TK) additive mask: 0 valid, -1e30 padded

    # Online logsumexp update.
    m_prev = m_scr[...]
    m_new = jnp.maximum(m_prev, jnp.max(s, axis=1, keepdims=True))
    alpha = jnp.exp(m_prev - m_new)
    l_scr[...] = alpha * l_scr[...] + jnp.sum(jnp.exp(s - m_new), axis=1,
                                              keepdims=True)
    m_scr[...] = m_new

    @pl.when(k == pl.num_programs(1) - 1)
    def _finalize():
        out_ref[...] = m_scr[...] + jnp.log(l_scr[...])


def ntxent_loss(z1, z2, *, temperature=TEMPERATURE, matmul_dtype=jnp.bfloat16):
    """z1, z2: [B, D] float arrays. Returns scalar float32 loss.

    matmul_dtype=jnp.bfloat16 (default) feeds the MXU native bf16 operands produced
    once in stage 1 (2-4x matmul throughput, half the inter-stage HBM traffic) at a
    ~1e-3-level accuracy cost; pass jnp.float32 for the tight-tolerance path.
    """
    assert z1.shape == z2.shape and z1.ndim == 2
    b, d = z1.shape
    b_pad = _round_up(b, 128)
    d_pad = _round_up(d, 128)

    # Tile heuristic: keep >= 2 q tiles whenever b_pad >= 256 so the "parallel"
    # q axis can shard across v7x's two TensorCores; 256-wide tiles when they divide.
    if b_pad <= 128:
        tile_q = b_pad
    elif b_pad < 512 or b_pad % 256 != 0:
        tile_q = 128
    else:
        tile_q = 256
    tile_k = 256 if (b_pad % 256 == 0 and b_pad >= 256) else 128
    tile_p = 128                       # stage-1 row tile (always divides b_pad)

    def pad(x):
        return jnp.pad(x.astype(jnp.float32), ((0, b_pad - b), (0, d_pad - d)))

    z1s, z2n, diag = _prep(pad(z1), pad(z2), inv_t=1.0 / temperature,
                           tile=tile_p, out_dtype=matmul_dtype)

    grid_q, grid_k = b_pad // tile_q, b_pad // tile_k
    use_bias = (b_pad != b)

    # z2n is the only truly streamed input along k: deepen its pipeline when the
    # per-step compute is short (>= 3 k steps).
    if grid_k >= 3:
        z2_spec = pl.BlockSpec((tile_k, d_pad), lambda q, k: (k, 0),
                               pipeline_mode=pl.Buffered(3))
    else:
        z2_spec = pl.BlockSpec((tile_k, d_pad), lambda q, k: (k, 0))

    in_specs = [pl.BlockSpec((tile_q, d_pad), lambda q, k: (q, 0)),  # z1n/T, resident
                z2_spec]                                             # z2n, streamed
    inputs = [z1s, z2n]
    if use_bias:
        col_bias = jnp.where(jnp.arange(b_pad) < b,
                             jnp.float32(0.0), jnp.float32(_NEG_BIG))
        inputs.append(col_bias.reshape(1, b_pad))
        in_specs.append(pl.BlockSpec((1, tile_k), lambda q, k: (0, k)))

    itemsize = jnp.dtype(matmul_dtype).itemsize
    cost = pl.CostEstimate(
        flops=2 * b_pad * b_pad * d_pad,
        transcendentals=b_pad * b_pad,
        bytes_accessed=(b_pad * d_pad * itemsize              # z1s: each q tile once
                        + grid_q * b_pad * d_pad * itemsize   # z2n: streamed per q tile
                        + b_pad * 4))                         # lse output

    lse = pl.pallas_call(
        functools.partial(_lse_kernel, use_bias=use_bias),
        out_shape=jax.ShapeDtypeStruct((b_pad, 1), jnp.float32),
        grid_spec=pltpu.PrefetchScalarGridSpec(
            num_scalar_prefetch=0,
            grid=(grid_q, grid_k),
            in_specs=in_specs,
            out_specs=pl.BlockSpec((tile_q, 1), lambda q, k: (q, 0)),
            scratch_shapes=[pltpu.VMEM((tile_q, 1), jnp.float32),   # running max
                            pltpu.VMEM((tile_q, 1), jnp.float32)],  # running sum-exp
        ),
        compiler_params=pltpu.CompilerParams(
            dimension_semantics=("parallel", "arbitrary"),
            vmem_limit_bytes=_VMEM_LIMIT,
        ),
        cost_estimate=cost,
    )(*inputs)

    # Final O(B) combine over the real (unpadded) rows in plain JAX.
    return jnp.mean(lse[:b, 0] - diag[:b, 0])


# ---------------------------------------------------------------------------
# Pure-JAX reference (matches the PyTorch module semantics)
# ---------------------------------------------------------------------------
def ntxent_loss_ref(z1, z2, temperature=TEMPERATURE):
    z1 = z1.astype(jnp.float32)
    z2 = z2.astype(jnp.float32)
    z1n = z1 / jnp.maximum(jnp.linalg.norm(z1, axis=1, keepdims=True), _NORM_EPS)
    z2n = z2 / jnp.maximum(jnp.linalg.norm(z2, axis=1, keepdims=True), _NORM_EPS)
    sim = jnp.dot(z1n, z2n.T, precision=lax.Precision.HIGHEST) / temperature
    lse = jax.scipy.special.logsumexp(sim, axis=1)
    return jnp.mean(lse - jnp.diagonal(sim))


if __name__ == "__main__":
    key = jax.random.PRNGKey(0)
    k1, k2, k3, k4 = jax.random.split(key, 4)

    # Small shape from the training script (exercises the padding / bias-mask path).
    batch, hidden = 8, 32
    z1 = jax.random.normal(k1, (batch, hidden), dtype=jnp.float32)
    z2 = jax.random.normal(k2, (batch, hidden), dtype=jnp.float32)
    ref = jax.block_until_ready(ntxent_loss_ref(z1, z2))
    loss_bf16 = jax.block_until_ready(ntxent_loss(z1, z2))  # bf16 MXU path (default)
    loss_f32 = jax.block_until_ready(ntxent_loss(z1, z2, matmul_dtype=jnp.float32))
    assert jnp.allclose(loss_bf16, ref, rtol=3e-2, atol=3e-2), (loss_bf16, ref)
    assert jnp.allclose(loss_f32, ref, rtol=1e-4, atol=1e-4), (loss_f32, ref)

    # Larger shape: multi-tile online logsumexp (grid 3x3), grid_q >= 2 for megacore,
    # Buffered(3) on the streamed k blocks, bias-free (no column padding) path.
    z1b = jax.random.normal(k3, (384, 160), dtype=jnp.float32)
    z2b = jax.random.normal(k4, (384, 160), dtype=jnp.float32)
    ref_b = jax.block_until_ready(ntxent_loss_ref(z1b, z2b))
    loss_b_bf16 = jax.block_until_ready(ntxent_loss(z1b, z2b))
    loss_b_f32 = jax.block_until_ready(ntxent_loss(z1b, z2b, matmul_dtype=jnp.float32))
    assert jnp.allclose(loss_b_bf16, ref_b, rtol=3e-2, atol=3e-2), (loss_b_bf16, ref_b)
    assert jnp.allclose(loss_b_f32, ref_b, rtol=1e-4, atol=1e-4), (loss_b_f32, ref_b)

    print("KERNEL_OK")
</pallas_src>

<mosaic_0001>
module attributes {stable_mosaic.version = 11 : i64} {
  func.func @_prep_kernel(%arg0: i32, %arg1: memref<128x128xf32, #tpu.memory_space<vmem>>, %arg2: memref<128x128xf32, #tpu.memory_space<vmem>>, %arg3: memref<128x128xbf16, #tpu.memory_space<vmem>>, %arg4: memref<128x128xbf16, #tpu.memory_space<vmem>>, %arg5: memref<128x1xf32, #tpu.memory_space<vmem>>) attributes {dimension_semantics = [#tpu.dimension_semantics<parallel>], iteration_bounds = array<i64: 1>, scalar_prefetch = 0 : i64, scratch_operands = 0 : i64, tpu.core_type = #tpu.core_type<tc>, window_params = [{transform_indices = @transform_0, window_bounds = array<i64: 128, 128>}, {transform_indices = @transform_1, window_bounds = array<i64: 128, 128>}, {transform_indices = @transform_2, window_bounds = array<i64: 128, 128>}, {transform_indices = @transform_3, window_bounds = array<i64: 128, 128>}, {transform_indices = @transform_4, window_bounds = array<i64: 128, 1>}]} {
    %c0 = arith.constant 0 : index
    %c0_0 = arith.constant 0 : index
    %0 = vector.load %arg1[%c0, %c0_0] : memref<128x128xf32, #tpu.memory_space<vmem>>, vector<128x128xf32>
    %c0_1 = arith.constant 0 : index
    %c0_2 = arith.constant 0 : index
    %1 = vector.load %arg2[%c0_1, %c0_2] : memref<128x128xf32, #tpu.memory_space<vmem>>, vector<128x128xf32>
    %2 = arith.mulf %0, %0 : vector<128x128xf32>
    %cst = arith.constant dense<0.000000e+00> : vector<128xf32>
    %3 = vector.multi_reduction <add>, %2, %cst [1] : vector<128x128xf32> to vector<128xf32>
    %4 = vector.shape_cast %3 : vector<128xf32> to vector<128x1xf32>
    %cst_3 = arith.constant 1.000000e-24 : f32
    %5 = vector.broadcast %cst_3 : f32 to vector<128x1xf32>
    %6 = arith.maximumf %4, %5 : vector<128x1xf32>
    %7 = math.rsqrt %6 : vector<128x1xf32>
    %8 = arith.mulf %1, %1 : vector<128x128xf32>
    %cst_4 = arith.constant dense<0.000000e+00> : vector<128xf32>
    %9 = vector.multi_reduction <add>, %8, %cst_4 [1] : vector<128x128xf32> to vector<128xf32>
    %10 = vector.shape_cast %9 : vector<128xf32> to vector<128x1xf32>
    %cst_5 = arith.constant 1.000000e-24 : f32
    %11 = vector.broadcast %cst_5 : f32 to vector<128x1xf32>
    %12 = arith.maximumf %10, %11 : vector<128x1xf32>
    %13 = math.rsqrt %12 : vector<128x1xf32>
    %cst_6 = arith.constant 1.000000e+01 : f32
    %14 = vector.broadcast %cst_6 : f32 to vector<128x1xf32>
    %15 = arith.mulf %7, %14 : vector<128x1xf32>
    %16 = vector.broadcast %15 : vector<128x1xf32> to vector<128x128xf32>
    %17 = arith.mulf %0, %16 : vector<128x128xf32>
    %18 = arith.truncf %17 : vector<128x128xf32> to vector<128x128xbf16>
    %19 = vector.broadcast %13 : vector<128x1xf32> to vector<128x128xf32>
    %20 = arith.mulf %1, %19 : vector<128x128xf32>
    %21 = arith.truncf %20 : vector<128x128xf32> to vector<128x128xbf16>
    %c0_7 = arith.constant 0 : index
    %c0_8 = arith.constant 0 : index
    %22 = vector.load %arg3[%c0_7, %c0_8] : memref<128x128xbf16, #tpu.memory_space<vmem>>, vector<128x128xbf16>
    tpu.vector_store %arg3[%c0_7, %c0_8], %18 {strides = array<i32>} : memref<128x128xbf16, #tpu.memory_space<vmem>>, vector<128x128xbf16>,
    %c0_9 = arith.constant 0 : index
    %c0_10 = arith.constant 0 : index
    %23 = vector.load %arg4[%c0_9, %c0_10] : memref<128x128xbf16, #tpu.memory_space<vmem>>, vector<128x128xbf16>
    tpu.vector_store %arg4[%c0_9, %c0_10], %21 {strides = array<i32>} : memref<128x128xbf16, #tpu.memory_space<vmem>>, vector<128x128xbf16>,
    %24 = arith.extf %18 : vector<128x128xbf16> to vector<128x128xf32>
    %25 = arith.extf %21 : vector<128x128xbf16> to vector<128x128xf32>
    %26 = arith.mulf %24, %25 : vector<128x128xf32>
    %cst_11 = arith.constant dense<0.000000e+00> : vector<128xf32>
    %27 = vector.multi_reduction <add>, %26, %cst_11 [1] : vector<128x128xf32> to vector<128xf32>
    %28 = vector.shape_cast %27 : vector<128xf32> to vector<128x1xf32>
    %c0_12 = arith.constant 0 : index
    %c0_13 = arith.constant 0 : index
    %29 = vector.load %arg5[%c0_12, %c0_13] : memref<128x1xf32, #tpu.memory_space<vmem>>, vector<128x1xf32>
    tpu.vector_store %arg5[%c0_12, %c0_13], %28 {strides = array<i32>} : memref<128x1xf32, #tpu.memory_space<vmem>>, vector<128x1xf32>,
    return
  }
  func.func @transform_0(%arg0: i32) -> (i32, i32) {
    %c0_i32 = arith.constant 0 : i32
    %c0_i32_0 = arith.constant 0 : i32
    return %arg0, %c0_i32 : i32, i32
  }
  func.func @transform_1(%arg0: i32) -> (i32, i32) {
    %c0_i32 = arith.constant 0 : i32
    %c0_i32_0 = arith.constant 0 : i32
    return %arg0, %c0_i32 : i32, i32
  }
  func.func @transform_2(%arg0: i32) -> (i32, i32) {
    %c0_i32 = arith.constant 0 : i32
    %c0_i32_0 = arith.constant 0 : i32
    return %arg0, %c0_i32 : i32, i32
  }
  func.func @transform_3(%arg0: i32) -> (i32, i32) {
    %c0_i32 = arith.constant 0 : i32
    %c0_i32_0 = arith.constant 0 : i32
    return %arg0, %c0_i32 : i32, i32
  }
  func.func @transform_4(%arg0: i32) -> (i32, i32) {
    %c0_i32 = arith.constant 0 : i32
    %c0_i32_0 = arith.constant 0 : i32
    return %arg0, %c0_i32 : i32, i32
  }
}

</mosaic_0001>

<bundles_post_ra>
// kernel: tpu_custom_call.1
= control target key start
LH: loop header
LB: loop body
LE: loop exit
PB: predicated region body
PF: predicated region fallthrough
CT: control target
= control target key end

     0   :  { %10 = vsyncpa [#allocation3], 0  ;;  %s2057_s0 = inlined_call_operand.hbm [shape: f32[128,128], index: 0, kind: input, shape index: {}]   ;;  %s2058_s1 = inlined_call_operand.hbm [shape: f32[128,128], index: 1, kind: input, shape index: {}]   ;;  %s2059_s2 = inlined_call_operand.hbm [shape: bf16[128,128], index: 2, kind: output, shape index: {0}]   ;;  %s2060_s3 = inlined_call_operand.hbm [shape: bf16[128,128], index: 3, kind: output, shape index: {1}]   ;;  %s2061_s4 = inlined_call_operand.vmem [shape: f32[128,1], index: 4, kind: output, shape index: {2}]  }
   0x1   :  { %11 = vsyncpa [#allocation6], 0 }
   0x2   :  { %12 = vsyncpa [#allocation4], 0 }
   0x3   :  { %13 = vsyncpa [#allocation9], 0  ;;  %s18_s17 = sshll.u32 %s2057_s0, 4  ;;  %s1063_s18 = smov [#allocation2]   ;;  %s19_s17 = int_to_ptr.hbm [resolvable:$true] %s18_s17 }
   0x4   :  { %s20_s19 = sshll.u32 %s1063_s18, 4  ;;  %s31_s22 = sshll.u32 %s2058_s1, 4  ;;  %s21_s19 = int_to_ptr.vmem [resolvable:$true] %s20_s19  ;;  %s32_s22 = int_to_ptr.hbm [resolvable:$true] %s31_s22 }
   0x5   :  { %s1064_s23 = smov 128   ;;  %s1065_s24 = smov 8  }
   0x6   :  { %26 = dma.hbm_to_vmem [thread:$0]  %s19_s17, 2048, %s21_s19, [#allocation3], %s1064_s23, %s1064_s23, %s1065_s24  }
   0x7   :  { %s1066_s25 = smov [#allocation5]  }
   0x8   :  { %s33_s26 = sshll.u32 %s1066_s25, 4  ;;  %s34_s26 = int_to_ptr.vmem [resolvable:$true] %s33_s26 }
   0x9   :  { %39 = dma.hbm_to_vmem [thread:$0]  %s32_s22, 2048, %s34_s26, [#allocation6], %s1064_s23, %s1064_s23, %s1065_s24  }
   0xa   :  { %1055 = dma.done.wait [#allocation3], 2048  }
   0xb   :  { %1056 = vsyncadd [#allocation3], 4294965248 }
   0xc   :  { %1057 = dma.done.wait [#allocation6], 2048  }
   0xd   :  { %1058 = vsyncadd [#allocation6], 4294965248  ;;  %v1102_v0 = vld [vmem:[#allocation2 + $0x20] sm:$0xff]  ;;  %v1104_v1 = vld [vmem:[#allocation2 + $0x10] sm:$0xff]  ;;  %s743_s27 = sshll.u32 %s2059_s2, 4  ;;  %s1067_s28 = smov [#allocation7]   ;;  %s744_s27 = int_to_ptr.hbm [resolvable:$true] %s743_s27 }
   0xe   :  { %v1106_v2 = vld [vmem:[#allocation2] sm:$0xff]  ;;  %v84_v3 = vmul.f32 %v1102_v0, %v1102_v0  ;;  %v82_v4 = vmul.f32 %v1104_v1, %v1104_v1  ;;  %v1114_v6 = vld [vmem:[#allocation2 + $0x28] sm:$0xff]  ;;  %v1116_v7 = vld [vmem:[#allocation2 + $0x18] sm:$0xff]  ;;  %s741_s29 = sshll.u32 %s1067_s28, 4  ;;  %s1068_s30 = smov [#allocation8]   ;;  %s742_s29 = int_to_ptr.vmem [resolvable:$true] %s741_s29 }
   0xf   :  { %v80_v5 = vmul.f32 %v1106_v2, %v1106_v2  ;;  %2090 = vst [vmem:[#allocation14_spill] sm:$0xff] %v1114_v6  ;;  %v1118_v8 = vld [vmem:[#allocation2 + $0x8] sm:$0xff]  ;;  %v85_v9 = vmul.f32 %v1114_v6, %v1114_v6  ;;  %v83_v10 = vmul.f32 %v1116_v7, %v1116_v7  ;;  %v56_v12 = vld [vmem:[#allocation2 + $0x40] sm:$0xff]  ;;  %v1126_v13 = vld [vmem:[#allocation2 + $0x38] sm:$0xff]  ;;  %s754_s2 = sshll.u32 %s1068_s30, 4  ;;  %s756_s7 = sshll.u32 %s2060_s3, 4  ;;  %s755_s2 = int_to_ptr.vmem [resolvable:$true] %s754_s2  ;;  %s757_s7 = int_to_ptr.hbm [resolvable:$true] %s756_s7 }
  0x10   :  { %104 = vadd.xlane.f32.xlu2 %v84_v3  ;;  %100 = vadd.xlane.f32.xlu1 %v82_v4  ;;  %v81_v11 = vmul.f32 %v1118_v8, %v1118_v8  ;;  %v1128_v14 = vld [vmem:[#allocation2 + $0x30] sm:$0xff]  ;;  %v88_v15 = vmul.f32 %v56_v12, %v56_v12  ;;  %v87_v16 = vmul.f32 %v1126_v13, %v1126_v13  ;;  %v59_v18 = vld [vmem:[#allocation2 + $0x58] sm:$0xff]  ;;  %v57_v20 = vld [vmem:[#allocation2 + $0x48] sm:$0xff]  ;;  %s1069_s8 = smov 64   ;;  %s1070_s9 = smov 4  }
  0x11   :  { %96 = vadd.xlane.f32.xlu0 %v80_v5  ;;  %2091 = vst [vmem:[#allocation15_spill] sm:$0xff] %v1128_v14  ;;  %v86_v17 = vmul.f32 %v1128_v14, %v1128_v14  ;;  %v58_v19 = vld [vmem:[#allocation2 + $0x50] sm:$0xff]  ;;  %v91_v21 = vmul.f32 %v59_v18, %v59_v18  ;;  %v89_v23 = vmul.f32 %v57_v20, %v57_v20  ;;  %v61_v25 = vld [vmem:[#allocation2 + $0x68] sm:$0xff]  ;;  %v60_v26 = vld [vmem:[#allocation2 + $0x60] sm:$0xff] }
  0x12   :  { %v90_v22 = vmul.f32 %v58_v19, %v58_v19  ;;  %v62_v24 = vld [vmem:[#allocation2 + $0x70] sm:$0xff]  ;;  %v93_v28 = vmul.f32 %v61_v25, %v61_v25  ;;  %v92_v29 = vmul.f32 %v60_v26, %v60_v26  ;;  %v1134_v30 = vld [vmem:[#allocation5 + $0x8] sm:$0xff]  ;;  %v1136_v31 = vld [vmem:[#allocation5] sm:$0xff] }
  0x13   :  { %v94_v27 = vmul.f32 %v62_v24, %v62_v24  ;;  %v63_v32 = vld [vmem:[#allocation2 + $0x78] sm:$0xff]  ;;  %v305_v33 = vmul.f32 %v1134_v30, %v1134_v30  ;;  %v304_v34 = vmul.f32 %v1136_v31, %v1136_v31  ;;  %v1142_v36 = vld [vmem:[#allocation5 + $0x20] sm:$0xff]  ;;  %v1146_v38 = vld [vmem:[#allocation5 + $0x10] sm:$0xff] }
  0x14   :  { %v95_v35 = vmul.f32 %v63_v32, %v63_v32  ;;  %v1144_v37 = vld [vmem:[#allocation5 + $0x18] sm:$0xff]  ;;  %v308_v39 = vmul.f32 %v1142_v36, %v1142_v36  ;;  %v306_v41 = vmul.f32 %v1146_v38, %v1146_v38  ;;  %v1156_v43 = vld [vmem:[#allocation5 + $0x30] sm:$0xff]  ;;  %v1158_v44 = vld [vmem:[#allocation5 + $0x28] sm:$0xff] }
  0x15   :  { %v307_v40 = vmul.f32 %v1144_v37, %v1144_v37  ;;  %v1154_v42 = vld [vmem:[#allocation5 + $0x38] sm:$0xff]  ;;  %2092 = vst [vmem:[#allocation16_spill] sm:$0xff] %v1156_v43  ;;  %v310_v46 = vmul.f32 %v1156_v43, %v1156_v43  ;;  %v309_v47 = vmul.f32 %v1158_v44, %v1158_v44  ;;  %v1166_v48 = vld [vmem:[#allocation5 + $0x50] sm:$0xff]  ;;  %v1168_v49 = vld [vmem:[#allocation5 + $0x48] sm:$0xff] }
  0x16   :  { %2093 = vst [vmem:[#allocation17_spill] sm:$0xff] %v1158_v44  ;;  %v311_v45 = vmul.f32 %v1154_v42, %v1154_v42  ;;  %v72_v50 = vld [vmem:[#allocation5 + $0x40] sm:$0xff]  ;;  %v314_v51 = vmul.f32 %v1166_v48, %v1166_v48  ;;  %v313_v52 = vmul.f32 %v1168_v49, %v1168_v49  ;;  %v77_v54 = vld [vmem:[#allocation5 + $0x68] sm:$0xff]  ;;  %v75_v56 = vld [vmem:[#allocation5 + $0x58] sm:$0xff] }
  0x17   :  { %2094 = vst [vmem:[#allocation18_spill] sm:$0xff] %v1166_v48  ;;  %v312_v53 = vmul.f32 %v72_v50, %v72_v50  ;;  %v76_v55 = vld [vmem:[#allocation5 + $0x60] sm:$0xff]  ;;  %v317_v57 = vmul.f32 %v77_v54, %v77_v54  ;;  %v315_v59 = vmul.f32 %v75_v56, %v75_v56  ;;  %v79_v60 = vld [vmem:[#allocation5 + $0x78] sm:$0xff]  ;;  %v78_v61 = vld [vmem:[#allocation5 + $0x70] sm:$0xff] }
  0x18   :  { %106 = vadd.xlane.f32.xlu2 %v85_v9  ;;  %102 = vadd.xlane.f32.xlu1 %v83_v10  ;;  %2095 = vst [vmem:[#allocation19_spill] sm:$0xff] %v1168_v49  ;;  %v316_v58 = vmul.f32 %v76_v55, %v76_v55  ;;  %v319_v62 = vmul.f32 %v79_v60, %v79_v60 }
  0x19   :  { %98 = vadd.xlane.f32.xlu0 %v81_v11  ;;  %v318_v63 = vmul.f32 %v78_v61, %v78_v61 }
  0x20   :  { %112 = vadd.xlane.f32.xlu2 %v88_v15  ;;  %110 = vadd.xlane.f32.xlu1 %v87_v16 }
  0x21   :  { %108 = vadd.xlane.f32.xlu0 %v86_v17 }
  0x28   :  { %118 = vadd.xlane.f32.xlu2 %v91_v21  ;;  %116 = vadd.xlane.f32.xlu1 %v90_v22 }
  0x29   :  { %114 = vadd.xlane.f32.xlu0 %v89_v23 }
  0x30   :  { %124 = vadd.xlane.f32.xlu2 %v94_v27  ;;  %122 = vadd.xlane.f32.xlu1 %v93_v28 }
  0x31   :  { %120 = vadd.xlane.f32.xlu0 %v92_v29 }
  0x38   :  { %322 = vadd.xlane.f32.xlu2 %v305_v33  ;;  %320 = vadd.xlane.f32.xlu1 %v304_v34 }
  0x39   :  { %126 = vadd.xlane.f32.xlu0 %v95_v35 }
  0x40   :  { %328 = vadd.xlane.f32.xlu2 %v308_v39  ;;  %326 = vadd.xlane.f32.xlu1 %v307_v40 }
  0x41   :  { %324 = vadd.xlane.f32.xlu0 %v306_v41 }
  0x48   :  { %334 = vadd.xlane.f32.xlu2 %v311_v45  ;;  %332 = vadd.xlane.f32.xlu1 %v310_v46 }
  0x49   :  { %330 = vadd.xlane.f32.xlu0 %v309_v47 }
  0x50   :  { %340 = vadd.xlane.f32.xlu2 %v314_v51  ;;  %338 = vadd.xlane.f32.xlu1 %v313_v52 }
  0x51   :  { %336 = vadd.xlane.f32.xlu0 %v312_v53 }
  0x58   :  { %346 = vadd.xlane.f32.xlu2 %v317_v57  ;;  %344 = vadd.xlane.f32.xlu1 %v316_v58 }
  0x59   :  { %342 = vadd.xlane.f32.xlu0 %v315_v59 }
  0x60   :  { %350 = vadd.xlane.f32.xlu1 %v319_v62 }
  0x61   :  { %348 = vadd.xlane.f32.xlu0 %v318_v63 }
  0x83   :  { %v105_v3 = vpop.xlane.xlu2 %104  ;;  %v101_v4 = vpop.xlane.xlu1 %100 }
  0x84   :  { %v97_v5 = vpop.xlane.xlu0 %96  ;;  %v1178_v18 = vmax.f32 %v105_v3, 1e-24  ;;  %v1180_v19 = vmax.f32 %v101_v4, 1e-24 }
  0x85   :  { %v128_v9 = vmax.f32 %v97_v5, 1e-24 }
  0x86   :  { %vm190_vm6 = vweird.f32 %v1178_v18  ;;  %vm170_vm13 = vweird.f32 %v1180_v19 }
  0x87   :  { %881 = vrsqrt.f32 %v128_v9  ;;  %vm150_vm3 = vweird.f32 %v128_v9 }
  0x8b   :  { %v107_v10 = vpop.xlane.xlu2 %106  ;;  %v103_v11 = vpop.xlane.xlu1 %102 }
  0x8c   :  { %v1174_v12 = vmax.f32 %v103_v11, 1e-24  ;;  %v99_v15 = vpop.xlane.xlu0 %98  ;;  %v1187_v24 = vmax.f32 %v107_v10, 1e-24 }
  0x8d   :  { %v129_v16 = vmax.f32 %v99_v15, 1e-24  ;;  %v1176_v17 = vpop.eup %881 }
  0x8e   :  { %v145_v20 = vmul.f32 %v1176_v17, %v128_v9  ;;  %883 = vrsqrt.f32 %v1174_v12  ;;  %vm151_vm1 = vweird.f32 %v1176_v17  ;;  %vm180_vm9 = vweird.f32 %v1174_v12 }
  0x8f   :  { %885 = vrsqrt.f32 %v129_v16  ;;  %vm160_vm2 = vweird.f32 %v129_v16  ;;  %vm1229_vm5 = vmor %vm150_vm3, %vm151_vm1  ;;  %vm200_vm1 = vweird.f32 %v1187_v24 }
  0x90   :  { %887 = vrsqrt.f32 %v1178_v18  ;;  %v146_v21 = vmul.f32 %v1176_v17, %v145_v20 }
  0x91   :  { %889 = vrsqrt.f32 %v1180_v19 }
  0x92   :  { %v147_v28 = vmul.f32 0.5, %v146_v21  ;;  %891 = vrsqrt.f32 %v1187_v24 }
  0x93   :  { %v113_v22 = vpop.xlane.xlu2 %112  ;;  %v111_v23 = vpop.xlane.xlu1 %110 }
  0x94   :  { %v109_v25 = vpop.xlane.xlu0 %108  ;;  %v1189_v26 = vpop.eup %883  ;;  %v1193_v32 = vmax.f32 %v113_v22, 1e-24  ;;  %v1198_v35 = vmax.f32 %v111_v23, 1e-24  ;;  %v148_v45 = vsub.f32 1.5, %v147_v28 }
  0x95   :  { %v886_v27 = vpop.eup %885  ;;  %v175_v29 = vmul.f32 %v1189_v26, %v1174_v12  ;;  %v1202_v41 = vmax.f32 %v109_v25, 1e-24  ;;  %vm181_vm7 = vweird.f32 %v1189_v26 }
  0x96   :  { %v155_v33 = vmul.f32 %v886_v27, %v129_v16  ;;  %v1195_v34 = vpop.eup %887  ;;  %893 = vrsqrt.f32 %v1193_v32  ;;  %vm161_vm0 = vweird.f32 %v886_v27  ;;  %v149_v58 = vmul.f32 %v1176_v17, %v148_v45  ;;  %vm1276_vm10 = vmor %vm180_vm9, %vm181_vm7 }
  0x97   :  { %v1200_v39 = vpop.eup %889  ;;  %v176_v46 = vmul.f32 %v1189_v26, %v175_v29  ;;  %v185_v52 = vmul.f32 %v1195_v34, %v1178_v18  ;;  %895 = vrsqrt.f32 %v1198_v35  ;;  %vm1225_vm4 = vmor %vm160_vm2, %vm161_vm0  ;;  %vm191_vm8 = vweird.f32 %v1195_v34 }
  0x98   :  { %v156_v40 = vmul.f32 %v886_v27, %v155_v33  ;;  %v165_v53 = vmul.f32 %v1200_v39, %v1180_v19  ;;  %897 = vrsqrt.f32 %v1202_v41  ;;  %v1214_v57 = vpop.eup %891  ;;  %v153_v9 = vsel %vm1229_vm5, %v1176_v17, %v149_v58  ;;  %vm1313_vm12 = vmor %vm190_vm6, %vm191_vm8 }
  0x99   :  { %v177_v59 = vmul.f32 0.5, %v176_v46  ;;  %v186_v63 = vmul.f32 %v1195_v34, %v185_v52  ;;  %v195_v10 = vmul.f32 %v1214_v57, %v1187_v24  ;;  %v528_v46 = vmul.f32 10.0, %v153_v9 }
  0x9a   :  { %v157_v47 = vmul.f32 0.5, %v156_v40  ;;  %v166_v3 = vmul.f32 %v1200_v39, %v165_v53  ;;  %vm171_vm11 = vweird.f32 %v1200_v39  ;;  %vm201_vm2 = vweird.f32 %v1214_v57 }
  0x9b   :  { %v119_v50 = vpop.xlane.xlu2 %118  ;;  %v117_v51 = vpop.xlane.xlu1 %116  ;;  %v178_v20 = vsub.f32 1.5, %v177_v59  ;;  %v187_v28 = vmul.f32 0.5, %v186_v63  ;;  %v196_v45 = vmul.f32 %v1214_v57, %v195_v10  ;;  %v544_v5 = vmul.f32 %v528_v46, %v1106_v2  ;;  %vm1323_vm14 = vmor %vm170_vm13, %vm171_vm11 }
  0x9c   :  { %v1211_v54 = vmax.f32 %v119_v50, 1e-24  ;;  %v115_v55 = vpop.xlane.xlu0 %114  ;;  %v158_v56 = vsub.f32 1.5, %v157_v47  ;;  %v1218_v60 = vmax.f32 %v117_v51, 1e-24  ;;  %v1221_v62 = vpop.eup %893  ;;  %vm1504_vm8 = vmor %vm200_vm1, %vm201_vm2  ;;  %vm220_vm2 = vweird.f32 %v1198_v35 }
  0x9d   :  { %v1235_v11 = vmax.f32 %v115_v55, 1e-24  ;;  %v1239_v16 = vpop.eup %895  ;;  %v225_v22 = vmul.f32 %v1221_v62, %v1193_v32  ;;  %v179_v47 = vmul.f32 %v1189_v26, %v178_v20 }
  0x9e   :  { %2096 = vst [vmem:[#allocation20_spill] sm:$0xff] %v1211_v54  ;;  %v159_v61 = vmul.f32 %v886_v27, %v158_v56  ;;  %899 = vrsqrt.f32 %v1211_v54  ;;  %v1245_v21 = vpop.eup %897  ;;  %v215_v17 = vmul.f32 %v1239_v16, %v1198_v35  ;;  %v188_v56 = vsub.f32 1.5, %v187_v28 }
  0x9f   :  { %901 = vrsqrt.f32 %v1218_v60  ;;  %v205_v50 = vmul.f32 %v1245_v21, %v1202_v41  ;;  %v226_v52 = vmul.f32 %v1221_v62, %v225_v22 }
  0xa0   :  { %v163_v15 = vsel %vm1225_vm4, %v886_v27, %v159_v61  ;;  %v167_v27 = vmul.f32 0.5, %v166_v3  ;;  %903 = vrsqrt.f32 %v1235_v11  ;;  %v197_v3 = vmul.f32 0.5, %v196_v45 }
  0xa1   :  { %v529_v33 = vmul.f32 10.0, %v163_v15  ;;  %v216_v12 = vmul.f32 %v1239_v16, %v215_v17  ;;  %v206_v10 = vmul.f32 %v1245_v21, %v205_v50  ;;  %v227_v20 = vmul.f32 0.5, %v226_v52 }
  0xa2   :  { %v168_v63 = vsub.f32 1.5, %v167_v27  ;;  %v198_v45 = vsub.f32 1.5, %v197_v3  ;;  %v560_v50 = vpack.c.bf16 %v544_v5, %v544_v5 }
  0xa3   :  { %v125_v23 = vpop.xlane.xlu2 %124  ;;  %v123_v25 = vpop.xlane.xlu1 %122  ;;  %v1274_v61 = vmul.f32 %v529_v33, %v1118_v8  ;;  %v183_v8 = vsel %vm1276_vm10, %v1189_v26, %v179_v47  ;;  %v217_v17 = vmul.f32 0.5, %v216_v12  ;;  %v207_v46 = vmul.f32 0.5, %v206_v10 }
  0xa4   :  { %v121_v29 = vpop.xlane.xlu0 %120  ;;  %v1250_v40 = vpop.eup %899  ;;  %v1260_v51 = vmax.f32 %v125_v23, 1e-24  ;;  %v1265_v53 = vmax.f32 %v123_v25, 1e-24  ;;  %v1304_v33 = vmul.f32 %v1200_v39, %v168_v63  ;;  %v531_v63 = vmul.f32 10.0, %v183_v8 }
  0xa5   :  { %2101 = vst [vmem:[#allocation21_spill] sm:$0xff] %v1250_v40  ;;  %v1267_v55 = vpop.eup %901  ;;  %v255_v58 = vmul.f32 %v1250_v40, %v1211_v54  ;;  %v1271_v59 = vmax.f32 %v121_v29, 1e-24  ;;  %v782_v23 = vpack.c.bf16 %v1274_v61, %v544_v5  ;;  %v1301_v29 = vmul.f32 %v1195_v34, %v188_v56 }
  0xa6   :  { %2102 = vst [vmem:[#allocation22_spill] sm:$0xff] %v1260_v51  ;;  %905 = vrsqrt.f32 %v1260_v51  ;;  %v1288_v15 = vpop.eup %903  ;;  %v245_v9 = vmul.f32 %v1267_v55, %v1218_v60  ;;  %v228_v56 = vsub.f32 1.5, %v227_v20  ;;  %v1333_v19 = vmul.f32 %v1214_v57, %v198_v45 }
  0xa7   :  { %2103 = vst [vmem:[#allocation23_spill] sm:$0xff] %v1265_v53  ;;  %907 = vrsqrt.f32 %v1265_v53  ;;  %v256_v25 = vmul.f32 %v1250_v40, %v255_v58  ;;  %v235_v47 = vmul.f32 %v1288_v15, %v1235_v11  ;;  %v218_v10 = vsub.f32 1.5, %v217_v17 }
  0xa8   :  { %2104 = vst [vmem:[#allocation24_spill] sm:$0xff] %v1271_v59  ;;  %909 = vrsqrt.f32 %v1271_v59  ;;  %v246_v58 = vmul.f32 %v1267_v55, %v245_v9  ;;  %v193_v8 = vsel %vm1313_vm12, %v1195_v34, %v1301_v29  ;;  %v1356_v52 = vmul.f32 %v531_v63, %v1116_v7 }
  0xa9   :  { %783 = vst [vmem:[#allocation7] sm:$0xff] %v782_v23   ;;  %v257_v12 = vmul.f32 0.5, %v256_v25  ;;  %v1346_v23 = vunpack.c.l.bf16 %v560_v50  ;;  %v561_v25 = vpack.c.bf16 %v1274_v61, %v1274_v61 }
  0xaa   :  { %2114 = vst [vmem:[#allocation28_spill] sm:$0xff] %v1333_v19  ;;  %v247_v45 = vmul.f32 0.5, %v246_v58  ;;  %v1366_v58 = vmul.f32 %v1239_v16, %v218_v10 }
  0xab   :  { %v323_v22 = vpop.xlane.xlu2 %322  ;;  %v321_v2 = vpop.xlane.xlu1 %320 }
  0xac   :  { %v1296_v28 = vmax.f32 %v323_v22, 1e-24  ;;  %v1298_v27 = vmax.f32 %v321_v2, 1e-24  ;;  %v127_v26 = vpop.xlane.xlu0 %126  ;;  %v1319_v3 = vpop.eup %905  ;;  %v208_v22 = vsub.f32 1.5, %v207_v46  ;;  %v236_v2 = vmul.f32 %v1288_v15, %v235_v47 }
  0xad   :  { %2109 = vst [vmem:[#allocation25_spill] sm:$0xff] %v1319_v3  ;;  %v1328_v18 = vmax.f32 %v127_v26, 1e-24  ;;  %v1330_v5 = vpop.eup %907  ;;  %v1351_v26 = vmul.f32 %v1221_v62, %v228_v56  ;;  %v285_v34 = vmul.f32 %v1319_v3, %v1260_v51  ;;  %v258_v47 = vsub.f32 1.5, %v257_v12 }
  0xae   :  { %911 = vrsqrt.f32 %v1296_v28  ;;  %2113 = vst [vmem:[#allocation27_spill] sm:$0xff] %v1330_v5  ;;  %v1343_v9 = vpop.eup %909  ;;  %v275_v20 = vmul.f32 %v1330_v5, %v1265_v53  ;;  %v1380_v51 = vunpack.c.l.bf16 %v561_v25  ;;  %v248_v10 = vsub.f32 1.5, %v247_v45 }
  0xaf   :  { %913 = vrsqrt.f32 %v1298_v27  ;;  %2112 = vst [vmem:[#allocation26_spill] sm:$0xff] %v1328_v18  ;;  %v265_v7 = vmul.f32 %v1343_v9, %v1271_v59  ;;  %v1387_v59 = vmul.f32 %v1250_v40, %v258_v47  ;;  %vm384_vm15 = vweird.f32 %v1296_v28 }
  0xb0   :  { %2115 = vst [vmem:[#allocation29_spill] sm:$0xff] %v1343_v9  ;;  %915 = vrsqrt.f32 %v1328_v18  ;;  %v276_v25 = vmul.f32 %v1330_v5, %v275_v20  ;;  %vm374_vm0 = vweird.f32 %v1298_v27  ;;  %v1403_v47 = vmul.f32 %v1267_v55, %v248_v10 }
  0xb1   :  { %2116 = vst [vmem:[#allocation30_spill] sm:$0xff] %v1351_v26  ;;  %v286_v26 = vmul.f32 %v1319_v3, %v285_v34  ;;  %v266_v45 = vmul.f32 %v1343_v9, %v265_v7  ;;  %v532_v7 = vmul.f32 10.0, %v193_v8 }
  0xb2   :  { %2117 = vst [vmem:[#allocation31_spill] sm:$0xff] %v1387_v59  ;;  %v277_v10 = vmul.f32 0.5, %v276_v25 }
  0xb3   :  { %v329_v29 = vpop.xlane.xlu2 %328  ;;  %v327_v17 = vpop.xlane.xlu1 %326  ;;  %2119 = vst [vmem:[#allocation33_spill] sm:$0xff] %v1403_v47 }
  0xb4   :  { %v1358_v46 = vpop.eup %911  ;;  %v1361_v50 = vmax.f32 %v329_v29, 1e-24  ;;  %v1363_v61 = vmax.f32 %v327_v17, 1e-24  ;;  %v325_v56 = vpop.xlane.xlu0 %324  ;;  %v1377_v29 = vmul.f32 %v1245_v21, %v208_v22  ;;  %v237_v17 = vmul.f32 0.5, %v236_v2 }
  0xb5   :  { %v379_v63 = vmul.f32 %v1358_v46, %v1296_v28  ;;  %v1374_v12 = vpop.eup %913  ;;  %v1390_v22 = vmax.f32 %v325_v56, 1e-24  ;;  %v563_v2 = vpack.c.bf16 %v1356_v52, %v1356_v52  ;;  %v287_v56 = vmul.f32 0.5, %v286_v26 }
  0xb6   :  { %917 = vrsqrt.f32 %v1361_v50  ;;  %v369_v48 = vmul.f32 %v1374_v12, %v1298_v27  ;;  %v1397_v54 = vpop.eup %915  ;;  %v238_v53 = vsub.f32 1.5, %v237_v17  ;;  %v267_v26 = vmul.f32 0.5, %v266_v45 }
  0xb7   :  { %v380_v49 = vmul.f32 %v1358_v46, %v379_v63  ;;  %919 = vrsqrt.f32 %v1363_v61  ;;  %2118 = vst [vmem:[#allocation32_spill] sm:$0xff] %v1397_v54  ;;  %v1411_v44 = vunpack.c.l.bf16 %v563_v2  ;;  %v295_v8 = vmul.f32 %v1397_v54, %v1328_v18 }
  0xb8   :  { %v370_v63 = vmul.f32 %v1374_v12, %v369_v48  ;;  %921 = vrsqrt.f32 %v1390_v22  ;;  %vm375_vm3 = vweird.f32 %v1374_v12  ;;  %v288_v2 = vsub.f32 1.5, %v287_v56 }
  0xb9   :  { %v381_v34 = vmul.f32 0.5, %v380_v49  ;;  %v1430_v45 = vmul.f32 %v532_v7, %v1102_v0  ;;  %vm385_vm4 = vweird.f32 %v1358_v46  ;;  %v268_v56 = vsub.f32 1.5, %v267_v26  ;;  %vm1441_vm5 = vmor %vm374_vm0, %vm375_vm3 }
  0xba   :  { %v371_v59 = vmul.f32 0.5, %v370_v63  ;;  %v296_v0 = vmul.f32 %v1397_v54, %v295_v8  ;;  %v1455_v27 = vmul.f32 %v1319_v3, %v288_v2  ;;  %vm1459_vm6 = vmor %vm384_vm15, %vm385_vm4  ;;  %vm414_vm7 = vweird.f32 %v1361_v50 }
  0xbb   :  { %v335_v20 = vpop.xlane.xlu2 %334  ;;  %v333_v40 = vpop.xlane.xlu1 %332  ;;  %v382_v48 = vsub.f32 1.5, %v381_v34  ;;  %v1420_v34 = vmul.f32 %v1288_v15, %v238_v53  ;;  %2121 = vst [vmem:[#allocation35_spill] sm:$0xff] %v1430_v45  ;;  %vm404_vm9 = vweird.f32 %v1363_v61  ;;  %vm394_vm11 = vweird.f32 %v1390_v22 }
  0xbc   :  { %v1405_v49 = vpop.eup %917  ;;  %v1407_v6 = vmax.f32 %v335_v20, 1e-24  ;;  %v1409_v17 = vmax.f32 %v333_v40, 1e-24  ;;  %v331_v14 = vpop.xlane.xlu0 %330  ;;  %v372_v63 = vsub.f32 1.5, %v371_v59  ;;  %2124 = vst [vmem:[#allocation36_spill] sm:$0xff] %v1455_v27  ;;  %vm211_vm3 = vweird.f32 %v1245_v21 }
  0xbd   :  { %v1417_v47 = vpop.eup %919  ;;  %2120 = vst [vmem:[#allocation34_spill] sm:$0xff] %v1420_v34  ;;  %v409_v40 = vmul.f32 %v1405_v49, %v1361_v50  ;;  %v383_v53 = vmul.f32 %v1358_v46, %v382_v48  ;;  %v1437_v18 = vmax.f32 %v331_v14, 1e-24  ;;  %v278_v34 = vsub.f32 1.5, %v277_v10 }
  0xbe   :  { %923 = vrsqrt.f32 %v1407_v6  ;;  %v373_v25 = vmul.f32 %v1374_v12, %v372_v63  ;;  %v399_v59 = vmul.f32 %v1417_v47, %v1363_v61  ;;  %v1432_v20 = vpop.eup %921  ;;  %v297_v4 = vmul.f32 0.5, %v296_v0 }
  0xbf   :  { %925 = vrsqrt.f32 %v1409_v17  ;;  %v389_v7 = vmul.f32 %v1432_v20, %v1390_v22  ;;  %v410_v48 = vmul.f32 %v1405_v49, %v409_v40  ;;  %v1482_v3 = vmul.f32 %v1330_v5, %v278_v34 }
  0xc0   :  { %v400_v43 = vmul.f32 %v1417_v47, %v399_v59  ;;  %927 = vrsqrt.f32 %v1437_v18  ;;  %v377_v14 = vsel %vm1441_vm5, %v1374_v12, %v373_v25  ;;  %v564_v59 = vpack.c.bf16 %v1430_v45, %v1430_v45 }
  0xc1   :  { %v390_v26 = vmul.f32 %v1432_v20, %v389_v7  ;;  %v2127_v12 = vsel %vm1323_vm14, %v1200_v39, %v1304_v33  ;;  %v576_v27 = vmul.f32 %v377_v14, %v1136_v31  ;;  %v387_v7 = vsel %vm1459_vm6, %v1358_v46, %v383_v53  ;;  %2128 = vst [vmem:[#allocation37_spill] sm:$0xff] %v1482_v3 }
  0xc2   :  { %v530_v2 = vmul.f32 10.0, %v2127_v12  ;;  %v411_v31 = vmul.f32 0.5, %v410_v48  ;;  %v401_v14 = vmul.f32 0.5, %v400_v43  ;;  %v577_v53 = vmul.f32 %v387_v7, %v1134_v30 }
  0xc3   :  { %v341_v8 = vpop.xlane.xlu2 %340  ;;  %v339_v40 = vpop.xlane.xlu1 %338  ;;  %v391_v46 = vmul.f32 0.5, %v390_v26  ;;  %v1496_v0 = vunpack.c.l.bf16 %v564_v59  ;;  %v592_v48 = vpack.c.bf16 %v576_v27, %v576_v27  ;;  %v298_v26 = vsub.f32 1.5, %v297_v4 }
  0xc4   :  { %v1471_v25 = vpop.eup %923  ;;  %v1473_v28 = vmax.f32 %v341_v8, 1e-24  ;;  %v1475_v63 = vmax.f32 %v339_v40, 1e-24  ;;  %v337_v33 = vpop.xlane.xlu0 %336  ;;  %v1490_v40 = vmul.f32 %v1343_v9, %v268_v56  ;;  %v1513_v30 = vmul.f32 %v530_v2, %v1104_v1 }
  0xc5   :  { %v439_v39 = vmul.f32 %v1471_v25, %v1407_v6  ;;  %v1487_v8 = vpop.eup %925  ;;  %v1510_v43 = vmax.f32 %v337_v33, 1e-24  ;;  %vm415_vm10 = vweird.f32 %v1405_v49  ;;  %v412_v12 = vsub.f32 1.5, %v411_v31 }
  0xc6   :  { %2129 = vst [vmem:[#allocation38_spill] sm:$0xff] %v1490_v40  ;;  %929 = vrsqrt.f32 %v1473_v28  ;;  %v429_v34 = vmul.f32 %v1487_v8, %v1409_v17  ;;  %v1498_v10 = vpop.eup %927  ;;  %v402_v7 = vsub.f32 1.5, %v401_v14  ;;  %v656_v33 = vunpack.c.l.bf16 %v592_v48  ;;  %vm1555_vm15 = vmor %vm414_vm7, %vm415_vm10 }
  0xc7   :  { %931 = vrsqrt.f32 %v1475_v63  ;;  %v440_v59 = vmul.f32 %v1471_v25, %v439_v39  ;;  %v392_v40 = vsub.f32 1.5, %v391_v46  ;;  %v419_v2 = vmul.f32 %v1498_v10, %v1437_v18 }
  0xc8   :  { %933 = vrsqrt.f32 %v1510_v43  ;;  %v430_v1 = vmul.f32 %v1487_v8, %v429_v34  ;;  %v593_v4 = vpack.c.bf16 %v577_v53, %v577_v53  ;;  %v672_v24 = vmul.f32 %v656_v33, %v1346_v23 }
  0xc9   :  { %v822_v31 = vpack.c.bf16 %v577_v53, %v576_v27  ;;  %v1534_v48 = vmul.f32 %v1397_v54, %v298_v26  ;;  %vm405_vm12 = vweird.f32 %v1417_v47  ;;  %v441_v46 = vmul.f32 0.5, %v440_v59 }
  0xca   :  { %v413_v19 = vmul.f32 %v1405_v49, %v412_v12  ;;  %v403_v23 = vmul.f32 %v1417_v47, %v402_v7  ;;  %688 = vadd.xlane.f32.xlu2 %v672_v24  ;;  %v657_v27 = vunpack.c.l.bf16 %v593_v4  ;;  %vm395_vm13 = vweird.f32 %v1432_v20  ;;  %vm1567_vm0 = vmor %vm404_vm9, %vm405_vm12 }
  0xcb   :  { %v347_v39 = vpop.xlane.xlu2 %346  ;;  %v345_v3 = vpop.xlane.xlu1 %344  ;;  %2132 = vst [vmem:[#allocation39_spill] sm:$0xff] %v1534_v48  ;;  %v420_v53 = vmul.f32 %v1498_v10, %v419_v2  ;;  %vm221_vm14 = vweird.f32 %v1239_v16  ;;  %v393_v12 = vmul.f32 %v1432_v20, %v392_v40  ;;  %v442_v50 = vsub.f32 1.5, %v441_v46  ;;  %vm1592_vm5 = vmor %vm394_vm11, %vm395_vm13 }
  0xcc   :  { %v1526_v45 = vpop.eup %929  ;;  %v1529_v14 = vmax.f32 %v347_v39, 1e-24  ;;  %v1531_v9 = vmax.f32 %v345_v3, 1e-24  ;;  %823 = vst [vmem:[#allocation8] sm:$0xff] %v822_v31   ;;  %v431_v3 = vmul.f32 0.5, %v430_v1  ;;  %v343_v59 = vpop.xlane.xlu0 %342  ;;  %v673_v1 = vmul.f32 %v657_v27, %v1380_v51  ;;  %vm1640_vm13 = vmor %vm220_vm2, %vm221_vm14 }
  0xcd   :  { %v469_v34 = vmul.f32 %v1526_v45, %v1473_v28  ;;  %v1539_v5 = vpop.eup %931  ;;  %vm444_vm1 = vweird.f32 %v1407_v6  ;;  %v562_v51 = vpack.c.bf16 %v1513_v30, %v1513_v30  ;;  %vm445_vm4 = vweird.f32 %v1471_v25  ;;  %v2158_v6 = vld [vmem:[#allocation23_spill] sm:$0xff] }
  0xce   :  { %935 = vrsqrt.f32 %v1529_v14  ;;  %v459_v26 = vmul.f32 %v1539_v5, %v1475_v63  ;;  %v1548_v33 = vpop.eup %933  ;;  %690 = vadd.xlane.f32.xlu0 %v673_v1  ;;  %v1580_v61 = vmax.f32 %v343_v59, 1e-24  ;;  %v407_v39 = vsel %vm1567_vm0, %v1417_v47, %v403_v23  ;;  %vm1652_vm0 = vmor %vm444_vm1, %vm445_vm4 }
  0xcf   :  { %v470_v7 = vmul.f32 %v1526_v45, %v469_v34  ;;  %937 = vrsqrt.f32 %v1531_v9  ;;  %v449_v40 = vmul.f32 %v1548_v33, %v1510_v43  ;;  %v417_v31 = vsel %vm1555_vm15, %v1405_v49, %v413_v19 }
  0xd0   :  { %v460_v4 = vmul.f32 %v1539_v5, %v459_v26  ;;  %v432_v34 = vsub.f32 1.5, %v431_v3  ;;  %vm435_vm6 = vweird.f32 %v1487_v8  ;;  %v421_v27 = vmul.f32 0.5, %v420_v53 }
  0xd1   :  { %v450_v26 = vmul.f32 %v1548_v33, %v449_v40  ;;  %v579_v47 = vmul.f32 %v407_v39, %v1144_v37  ;;  %vm210_vm7 = vweird.f32 %v1202_v41  ;;  %v471_v19 = vmul.f32 0.5, %v470_v7 }
  0xd2   :  { %939 = vrsqrt.f32 %v1580_v61  ;;  %v1604_v22 = vmul.f32 %v417_v31, %v1142_v36  ;;  %v397_v49 = vsel %vm1592_vm5, %v1432_v20, %v393_v12  ;;  %v1610_v3 = vmul.f32 %v1471_v25, %v442_v50  ;;  %vm1668_vm14 = vmor %vm210_vm7, %vm211_vm3 }
  0xd3   :  { %vm434_vm9 = vweird.f32 %v1409_v17  ;;  %vm425_vm10 = vweird.f32 %v1498_v10  ;;  %v461_v37 = vmul.f32 0.5, %v460_v4  ;;  %vm424_vm11 = vweird.f32 %v1437_v18 }
  0xd4   :  { %v1599_v23 = vpop.eup %935  ;;  %v451_v36 = vmul.f32 0.5, %v450_v26  ;;  %v595_v24 = vpack.c.bf16 %v579_v47, %v579_v47  ;;  %v596_v20 = vpack.c.bf16 %v1604_v22, %v1604_v22  ;;  %v578_v12 = vmul.f32 %v397_v49, %v1146_v38  ;;  %vm1687_vm4 = vmor %vm434_vm9, %vm435_vm6 }
  0xd5   :  { %v499_v53 = vmul.f32 %v1599_v23, %v1529_v14  ;;  %v1616_v59 = vpop.eup %937  ;;  %v1623_v7 = vmul.f32 %v1487_v8, %v432_v34  ;;  %v422_v1 = vsub.f32 1.5, %v421_v27  ;;  %v472_v4 = vsub.f32 1.5, %v471_v19  ;;  %v351_v34 = vpop.xlane.xlu1 %350  ;;  %vm1702_vm5 = vmor %vm424_vm11, %vm425_vm10 }
  0xd6   :  { %v489_v50 = vmul.f32 %v1616_v59, %v1531_v9  ;;  %v659_v40 = vunpack.c.l.bf16 %v595_v24  ;;  %v660_v39 = vunpack.c.l.bf16 %v596_v20  ;;  %v594_v31 = vpack.c.bf16 %v578_v12, %v578_v12  ;;  %v349_v27 = vpop.xlane.xlu0 %348 }
  0xd7   :  { %v500_v2 = vmul.f32 %v1599_v23, %v499_v53  ;;  %vm251_vm12 = vweird.f32 %v1267_v55  ;;  %v462_v46 = vsub.f32 1.5, %v461_v37  ;;  %v787_v38 = vpack.c.bf16 %v1356_v52, %v1513_v30 }
  0xd8   :  { %v490_v48 = vmul.f32 %v1616_v59, %v489_v50  ;;  %v1632_v49 = vpop.eup %939  ;;  %v452_v53 = vsub.f32 1.5, %v451_v36  ;;  %v675_v54 = vmul.f32 %v659_v40, %v1411_v44  ;;  %v676_v19 = vmul.f32 %v660_v39, %v1496_v0 }
  0xd9   :  { %v501_v26 = vmul.f32 0.5, %v500_v2  ;;  %v827_v24 = vpack.c.bf16 %v579_v47, %v578_v12  ;;  %vm250_vm15 = vweird.f32 %v1218_v60  ;;  %v423_v52 = vmul.f32 %v1498_v10, %v422_v1  ;;  %859 = vst [vmem:[#allocation7 + $0x8] sm:$0xff] %v787_v38  }
  0xda   :  { %v491_v30 = vmul.f32 0.5, %v490_v48  ;;  %v479_v36 = vmul.f32 %v1632_v49, %v1580_v61  ;;  %v642_v44 = vunpack.c.l.bf16 %v562_v51  ;;  %694 = vadd.xlane.f32.xlu2 %v675_v54  ;;  %696 = vadd.xlane.f32.xlu0 %v676_v19  ;;  %v658_v0 = vunpack.c.l.bf16 %v594_v31 }
  0xdb   :  { %866 = vst [vmem:[#allocation8 + $0x8] sm:$0xff] %v827_v24   ;;  %v1656_v47 = vmax.f32 %v351_v34, 1e-24  ;;  %v1658_v48 = vmax.f32 %v349_v27, 1e-24  ;;  %v223_v51 = vsel %vm1640_vm13, %v1239_v16, %v1366_v58  ;;  %v1673_v54 = vmul.f32 %v1526_v45, %v472_v4  ;;  %v2152_v34 = vld [vmem:[#allocation17_spill] sm:$0xff] }
  0xdc   :  { %vm474_vm1 = vweird.f32 %v1473_v28  ;;  %vm475_vm2 = vweird.f32 %v1526_v45  ;;  %v502_v20 = vsub.f32 1.5, %v501_v26  ;;  %v480_v12 = vmul.f32 %v1632_v49, %v479_v36  ;;  %v2154_v24 = vld [vmem:[#allocation15_spill] sm:$0xff] }
  0xdd   :  { %v447_v16 = vsel %vm1652_vm0, %v1471_v25, %v1610_v3  ;;  %vm241_vm3 = vweird.f32 %v1288_v15  ;;  %v1692_v58 = vmul.f32 %v1539_v5, %v462_v46  ;;  %v1695_v1 = vmul.f32 %v1548_v33, %v452_v53  ;;  %v2153_v53 = vld [vmem:[#allocation27_spill] sm:$0xff] }
  0xde   :  { %v674_v2 = vmul.f32 %v658_v0, %v642_v44  ;;  %941 = vrsqrt.f32 %v1656_v47  ;;  %vm465_vm6 = vweird.f32 %v1539_v5  ;;  %v492_v17 = vsub.f32 1.5, %v491_v30  ;;  %v2157_v44 = vld [vmem:[#allocation14_spill] sm:$0xff] }
  0xdf   :  { %v481_v3 = vmul.f32 0.5, %v480_v12  ;;  %943 = vrsqrt.f32 %v1658_v48  ;;  %v535_v50 = vmul.f32 10.0, %v223_v51  ;;  %vm230_vm7 = vweird.f32 %v1193_v32 }
  0xe0   :  { %vm231_vm9 = vweird.f32 %v1221_v62  ;;  %vm240_vm13 = vweird.f32 %v1235_v11  ;;  %692 = vadd.xlane.f32.xlu1 %v674_v2  ;;  %v583_v18 = vmul.f32 %v447_v16, %v1154_v42  ;;  %v213_v4 = vsel %vm1668_vm14, %v1245_v21, %v1377_v29  ;;  %v2149_v21 = vld [vmem:[#allocation16_spill] sm:$0xff]  ;;  %v2159_v16 = vld [vmem:[#allocation33_spill] sm:$0xff] }
  0xe1   :  { %v437_v40 = vsel %vm1687_vm4, %v1487_v8, %v1623_v7  ;;  %v427_v39 = vsel %vm1702_vm5, %v1498_v10, %v423_v52  ;;  %vm464_vm10 = vweird.f32 %v1475_v63  ;;  %vm455_vm11 = vweird.f32 %v1548_v33  ;;  %v2150_v8 = vld [vmem:[#allocation28_spill] sm:$0xff]  ;;  %v2160_v2 = vld [vmem:[#allocation29_spill] sm:$0xff]  ;;  %v2197_v63 = vld [vmem:[#allocation38_spill] sm:$0xff] }
  0xe2   :  { %v1726_v42 = vmul.f32 %v1599_v23, %v502_v20  ;;  %v551_v31 = vmul.f32 %v535_v50, %v1126_v13  ;;  %v534_v46 = vmul.f32 10.0, %v213_v4  ;;  %v582_v29 = vmul.f32 %v437_v40, %v2149_v21  ;;  %v2162_v4 = vld [vmem:[#allocation21_spill] sm:$0xff]  ;;  %v2163_v21 = vld [vmem:[#allocation24_spill] sm:$0xff] }
  0xe3   :  { %v482_v26 = vsub.f32 1.5, %v481_v3  ;;  %v599_v38 = vpack.c.bf16 %v583_v18, %v583_v18  ;;  %v2151_v7 = vsel %vm1504_vm8, %v1214_v57, %v2150_v8  ;;  %v581_v27 = vmul.f32 %v427_v39, %v2152_v34  ;;  %vm1748_vm8 = vmor %vm250_vm15, %vm251_vm12  ;;  %v2172_v57 = vld [vmem:[#allocation34_spill] sm:$0xff] }
  0xe4   :  { %v533_v10 = vmul.f32 10.0, %v2151_v7  ;;  %vm454_vm14 = vweird.f32 %v1510_v43  ;;  %v1739_v19 = vmul.f32 %v1616_v59, %v492_v17  ;;  %v567_v13 = vpack.c.bf16 %v551_v31, %v551_v31  ;;  %v1742_v30 = vpop.eup %941  ;;  %vm1778_vm12 = vmor %vm474_vm1, %vm475_vm2  ;;  %v946_v43 = vld [vmem:[#allocation2 + $0x48] sm:$0xff] }
  0xe5   :  { %v550_v37 = vmul.f32 %v534_v46, %v2154_v24  ;;  %v598_v52 = vpack.c.bf16 %v582_v29, %v582_v29  ;;  %v663_v56 = vunpack.c.l.bf16 %v599_v38  ;;  %v837_v36 = vpack.c.bf16 %v583_v18, %v582_v29  ;;  %v1755_v51 = vpop.eup %943  ;;  %v2161_v18 = vld [vmem:[#allocation20_spill] sm:$0xff]  ;;  %vm1790_vm15 = vmor %vm240_vm13, %vm241_vm3 }
  0xe6   :  { %v549_v35 = vmul.f32 %v533_v10, %v2157_v44  ;;  %v597_v0 = vpack.c.bf16 %v581_v27, %v581_v27  ;;  %vm280_vm0 = vweird.f32 %v2158_v6  ;;  %v519_v60 = vmul.f32 %v1742_v30, %v1656_v47  ;;  %vm1803_vm2 = vmor %vm464_vm10, %vm465_vm6  ;;  %v953_v6 = vld [vmem:[#allocation5 + $0x58] sm:$0xff] }
  0xe7   :  { %v647_v20 = vunpack.c.l.bf16 %v567_v13  ;;  %v566_v12 = vpack.c.bf16 %v550_v37, %v550_v37  ;;  %v253_v41 = vsel %vm1748_vm8, %v1267_v55, %v2159_v16  ;;  %v1766_v25 = vmul.f32 %v1632_v49, %v482_v26  ;;  %868 = vst [vmem:[#allocation8 + $0x18] sm:$0xff] %v837_v36   ;;  %v2166_v26 = vld [vmem:[#allocation35_spill] sm:$0xff]  ;;  %vm1819_vm6 = vmor %vm230_vm7, %vm231_vm9  ;;  %v2178_v16 = vld [vmem:[#allocation32_spill] sm:$0xff] }
  0xe8   :  { %v509_v17 = vmul.f32 %v1755_v51, %v1658_v48  ;;  %v797_v3 = vpack.c.bf16 %v551_v31, %v550_v37  ;;  %v662_v50 = vunpack.c.l.bf16 %v598_v52  ;;  %vm261_vm4 = vweird.f32 %v2162_v4  ;;  %v2171_v37 = vld [vmem:[#allocation18_spill] sm:$0xff]  ;;  %vm1832_vm7 = vmor %vm454_vm14, %vm455_vm11 }
  0xe9   :  { %v520_v40 = vmul.f32 %v1742_v30, %v519_v60  ;;  %v679_v39 = vmul.f32 %v663_v56, %v647_v20  ;;  %v646_v46 = vunpack.c.l.bf16 %v566_v12  ;;  %v565_v55 = vpack.c.bf16 %v549_v35, %v549_v35  ;;  %v2177_v20 = vld [vmem:[#allocation19_spill] sm:$0xff] }
  0xea   :  { %vm270_vm8 = vweird.f32 %v2163_v21  ;;  %vm495_vm5 = vweird.f32 %v1616_v59  ;;  %v510_v31 = vmul.f32 %v1755_v51, %v509_v17  ;;  %861 = vst [vmem:[#allocation7 + $0x18] sm:$0xff] %v797_v3   ;;  %v792_v38 = vpack.c.bf16 %v549_v35, %v2166_v26  ;;  %v945_v35 = vld [vmem:[#allocation2 + $0x50] sm:$0xff]  ;;  %v947_v26 = vld [vmem:[#allocation5 + $0x40] sm:$0xff]  ;;  %v949_v21 = vld [vmem:[#allocation2 + $0x68] sm:$0xff] }
  0xeb   :  { %v832_v8 = vpack.c.bf16 %v581_v27, %v1604_v22  ;;  %v661_v7 = vunpack.c.l.bf16 %v597_v0  ;;  %vm485_vm1 = vweird.f32 %v1632_v49  ;;  %v521_v10 = vmul.f32 0.5, %v520_v40  ;;  %702 = vadd.xlane.f32.xlu0 %v679_v39 }
  0xec   :  { %v678_v34 = vmul.f32 %v662_v50, %v646_v46  ;;  %v645_v13 = vunpack.c.l.bf16 %v565_v55  ;;  %v477_v22 = vsel %vm1778_vm12, %v1526_v45, %v1673_v54  ;;  %vm494_vm3 = vweird.f32 %v1531_v9  ;;  %860 = vst [vmem:[#allocation7 + $0x10] sm:$0xff] %v792_v38   ;;  %v2183_v55 = vld [vmem:[#allocation22_spill] sm:$0xff] }
  0xed   :  { %v511_v27 = vmul.f32 0.5, %v510_v31  ;;  %v538_v24 = vmul.f32 10.0, %v253_v41  ;;  %v1809_v52 = vmul.f32 %v477_v22, %v2171_v37  ;;  %v243_v45 = vsel %vm1790_vm15, %v1288_v15, %v2172_v57  ;;  %867 = vst [vmem:[#allocation8 + $0x10] sm:$0xff] %v832_v8   ;;  %v2179_v41 = vld [vmem:[#allocation30_spill] sm:$0xff]  ;;  %v2190_v8 = vld [vmem:[#allocation37_spill] sm:$0xff]  ;;  %v950_v57 = vld [vmem:[#allocation5 + $0x68] sm:$0xff] }
  0xee   :  { %vm484_vm13 = vweird.f32 %v1580_v61  ;;  %v522_v54 = vsub.f32 1.5, %v521_v10  ;;  %700 = vadd.xlane.f32.xlu2 %v678_v34  ;;  %v677_v56 = vmul.f32 %v661_v7, %v645_v13  ;;  %v467_v36 = vsel %vm1803_vm2, %v1539_v5, %v1692_v58  ;;  %v948_v22 = vld [vmem:[#allocation2 + $0x40] sm:$0xff] }
  0xef   :  { %v537_v15 = vmul.f32 10.0, %v243_v45  ;;  %v512_v44 = vsub.f32 1.5, %v511_v27  ;;  %v1836_v0 = vmul.f32 %v945_v35, %v538_v24  ;;  %v602_v60 = vpack.c.bf16 %v1809_v52, %v1809_v52  ;;  %v952_v50 = vld [vmem:[#allocation2 + $0x60] sm:$0xff] }
  0xf0   :  { %v585_v12 = vmul.f32 %v467_v36, %v2177_v20  ;;  %vm301_vm9 = vweird.f32 %v2178_v16  ;;  %v1843_v5 = vmul.f32 %v1742_v30, %v522_v54  ;;  %698 = vadd.xlane.f32.xlu1 %v677_v56  ;;  %v233_v17 = vsel %vm1819_vm6, %v1221_v62, %v2179_v41 }
  0xf1   :  { %v553_v58 = vmul.f32 %v946_v43, %v537_v15  ;;  %v457_v3 = vsel %vm1832_vm7, %v1548_v33, %v1695_v1  ;;  %vm2180_vm10 = vweird.f32 %v2153_v53  ;;  %vm525_vm14 = vweird.f32 %v1742_v30  ;;  %v2184_v33 = vld [vmem:[#allocation25_spill] sm:$0xff]  ;;  %v2185_v1 = vld [vmem:[#allocation26_spill] sm:$0xff] }
  0xf2   :  { %vm1857_vm11 = vmor %vm280_vm0, %vm2180_vm10  ;;  %v1863_v40 = vmul.f32 %v1755_v51, %v512_v44  ;;  %v570_v62 = vpack.c.bf16 %v1836_v0, %v1836_v0  ;;  %v666_v39 = vunpack.c.l.bf16 %v602_v60  ;;  %v601_v46 = vpack.c.bf16 %v585_v12, %v585_v12 }
  0xf3   :  { %vm291_vm15 = vweird.f32 %v2184_v33  ;;  %vm300_vm2 = vweird.f32 %v2185_v1  ;;  %vm2186_vm0 = vweird.f32 %v1599_v23  ;;  %vm2187_vm6 = vweird.f32 %v1529_v14 }
  0xf4   :  { %vm1874_vm7 = vmor %vm2187_vm6, %vm2186_vm0  ;;  %v569_v29 = vpack.c.bf16 %v553_v58, %v553_v58  ;;  %v536_v31 = vmul.f32 10.0, %v233_v17  ;;  %v584_v38 = vmul.f32 %v947_v26, %v457_v3  ;;  %v283_v7 = vsel %vm1857_vm11, %v2153_v53, %v2190_v8  ;;  %v954_v26 = vld [vmem:[#allocation2 + $0x58] sm:$0xff] }
  0xf5   :  { %vm524_vm10 = vweird.f32 %v1656_v47  ;;  %v650_v28 = vunpack.c.l.bf16 %v570_v62  ;;  %v665_v10 = vunpack.c.l.bf16 %v601_v46  ;;  %v507_v14 = vsel %vm1874_vm7, %v1599_v23, %v1726_v42 }
  0xf6   :  { %v541_v34 = vmul.f32 10.0, %v283_v7  ;;  %vm2191_vm0 = vweird.f32 %v2160_v2  ;;  %v649_v53 = vunpack.c.l.bf16 %v569_v29  ;;  %v552_v11 = vmul.f32 %v948_v22, %v536_v31 }
  0xf7   :  { %vm1892_vm6 = vmor %vm270_vm8, %vm2191_vm0  ;;  %v600_v27 = vpack.c.bf16 %v584_v38, %v584_v38  ;;  %v842_v24 = vpack.c.bf16 %v585_v12, %v584_v38  ;;  %vm2194_vm11 = vweird.f32 %v2161_v18  ;;  %vm514_vm7 = vweird.f32 %v1658_v48  ;;  %v951_v12 = vld [vmem:[#allocation5 + $0x60] sm:$0xff] }
  0xf8   :  { %vm1900_vm12 = vmor %vm2194_vm11, %vm261_vm4  ;;  %v682_v42 = vmul.f32 %v666_v39, %v650_v28  ;;  %v557_v37 = vmul.f32 %v949_v21, %v541_v34  ;;  %v589_v45 = vmul.f32 %v950_v57, %v507_v14  ;;  %v273_v54 = vsel %vm1892_vm6, %v2160_v2, %v2197_v63  ;;  %v957_v57 = vld [vmem:[#allocation5 + $0x70] sm:$0xff] }
  0xf9   :  { %vm1913_vm4 = vmor %vm494_vm3, %vm495_vm5  ;;  %v681_v56 = vmul.f32 %v665_v10, %v649_v53  ;;  %v568_v36 = vpack.c.bf16 %v552_v11, %v552_v11  ;;  %v802_v15 = vpack.c.bf16 %v553_v58, %v552_v11  ;;  %869 = vst [vmem:[#allocation8 + $0x20] sm:$0xff] %v842_v24   ;;  %v664_v32 = vunpack.c.l.bf16 %v600_v27  ;;  %v2202_v58 = vld [vmem:[#allocation31_spill] sm:$0xff]  ;;  %v955_v11 = vld [vmem:[#allocation5 + $0x78] sm:$0xff] }
  0xfa   :  { %vm1921_vm8 = vmor %vm484_vm13, %vm485_vm1  ;;  %708 = vadd.xlane.f32.xlu0 %v682_v42  ;;  %v573_v2 = vpack.c.bf16 %v557_v37, %v557_v37  ;;  %v605_v9 = vpack.c.bf16 %v589_v45, %v589_v45  ;;  %v497_v35 = vsel %vm1913_vm4, %v1616_v59, %v1739_v19  ;;  %v540_v60 = vmul.f32 10.0, %v273_v54  ;;  %v2207_v10 = vld [vmem:[#allocation39_spill] sm:$0xff]  ;;  %v2214_v24 = vld [vmem:[#allocation36_spill] sm:$0xff] }
  0xfb   :  { %706 = vadd.xlane.f32.xlu2 %v681_v56  ;;  %862 = vst [vmem:[#allocation7 + $0x20] sm:$0xff] %v802_v15   ;;  %v648_v20 = vunpack.c.l.bf16 %v568_v36  ;;  %v588_v43 = vmul.f32 %v951_v12, %v497_v35  ;;  %v263_v61 = vsel %vm1900_vm12, %v2162_v4, %v2202_v58  ;;  %v487_v41 = vsel %vm1921_vm8, %v1632_v49, %v1766_v25  ;;  %vm1941_vm5 = vmor %vm300_vm2, %vm301_vm9  ;;  %v956_v42 = vld [vmem:[#allocation2 + $0x78] sm:$0xff]  ;;  %v958_v63 = vld [vmem:[#allocation2 + $0x70] sm:$0xff] }
  0xfc   :  { %v653_v17 = vunpack.c.l.bf16 %v573_v2  ;;  %v669_v3 = vunpack.c.l.bf16 %v605_v9  ;;  %v556_v59 = vmul.f32 %v952_v50, %v540_v60  ;;  %v539_v19 = vmul.f32 10.0, %v263_v61  ;;  %vm1949_vm1 = vmor %vm524_vm10, %vm525_vm14 }
  0xfd   :  { %v680_v62 = vmul.f32 %v664_v32, %v648_v20  ;;  %v604_v39 = vpack.c.bf16 %v588_v43, %v588_v43  ;;  %v852_v46 = vpack.c.bf16 %v589_v45, %v588_v43  ;;  %v587_v29 = vmul.f32 %v953_v6, %v487_v41 }
  0xfe   :  { %v685_v31 = vmul.f32 %v669_v3, %v653_v17  ;;  %v572_v49 = vpack.c.bf16 %v556_v59, %v556_v59  ;;  %v812_v25 = vpack.c.bf16 %v557_v37, %v556_v59  ;;  %v555_v38 = vmul.f32 %v954_v26, %v539_v19 }
  0xff   :  { %704 = vadd.xlane.f32.xlu1 %v680_v62  ;;  %871 = vst [vmem:[#allocation8 + $0x30] sm:$0xff] %v852_v46   ;;  %v668_v1 = vunpack.c.l.bf16 %v604_v39  ;;  %v603_v7 = vpack.c.bf16 %v587_v29, %v587_v29  ;;  %v847_v28 = vpack.c.bf16 %v587_v29, %v1809_v52  ;;  %v303_v14 = vsel %vm1941_vm5, %v2178_v16, %v2207_v10 }
 0x100   :  { %vm2208_vm3 = vweird.f32 %v2183_v55  ;;  %864 = vst [vmem:[#allocation7 + $0x30] sm:$0xff] %v812_v25   ;;  %v652_v34 = vunpack.c.l.bf16 %v572_v49  ;;  %v571_v13 = vpack.c.bf16 %v555_v38, %v555_v38  ;;  %v807_v53 = vpack.c.bf16 %v555_v38, %v1836_v0 }
 0x101   :  { %vm1962_vm13 = vmor %vm2208_vm3, %vm291_vm15  ;;  %v527_v52 = vsel %vm1949_vm1, %v1742_v30, %v1843_v5  ;;  %vm2211_vm9 = vweird.f32 %v1755_v51  ;;  %870 = vst [vmem:[#allocation8 + $0x28] sm:$0xff] %v847_v28   ;;  %v667_v55 = vunpack.c.l.bf16 %v603_v7  ;;  %v543_v22 = vmul.f32 10.0, %v303_v14 }
 0x102   :  { %vm1975_vm14 = vmor %vm514_vm7, %vm2211_vm9  ;;  %v591_v27 = vmul.f32 %v955_v11, %v527_v52  ;;  %v293_v0 = vsel %vm1962_vm13, %v2184_v33, %v2214_v24  ;;  %714 = vadd.xlane.f32.xlu0 %v685_v31  ;;  %v684_v30 = vmul.f32 %v668_v1, %v652_v34  ;;  %863 = vst [vmem:[#allocation7 + $0x28] sm:$0xff] %v807_v53   ;;  %v651_v5 = vunpack.c.l.bf16 %v571_v13 }
 0x103   :  { %v517_v48 = vsel %vm1975_vm14, %v1755_v51, %v1863_v40  ;;  %v542_v23 = vmul.f32 10.0, %v293_v0  ;;  %v559_v21 = vmul.f32 %v956_v42, %v543_v22  ;;  %vm720_vm12 = vcmask 7168  }
 0x104   :  { %v607_v37 = vpack.c.bf16 %v591_v27, %v591_v27  ;;  %v590_v45 = vmul.f32 %v957_v57, %v517_v48  ;;  %712 = vadd.xlane.f32.xlu2 %v684_v30  ;;  %v683_v33 = vmul.f32 %v667_v55, %v651_v5 }
 0x105   :  { %v558_v54 = vmul.f32 %v958_v63, %v542_v23  ;;  %v575_v18 = vpack.c.bf16 %v559_v21, %v559_v21 }
 0x106   :  { %v671_v56 = vunpack.c.l.bf16 %v607_v37  ;;  %v606_v51 = vpack.c.bf16 %v590_v45, %v590_v45  ;;  %v857_v40 = vpack.c.bf16 %v591_v27, %v590_v45 }
 0x107   :  { %v574_v36 = vpack.c.bf16 %v558_v54, %v558_v54  ;;  %v817_v15 = vpack.c.bf16 %v559_v21, %v558_v54  ;;  %710 = vadd.xlane.f32.xlu1 %v683_v33  ;;  %v655_v32 = vunpack.c.l.bf16 %v575_v18 }
 0x108   :  { %872 = vst [vmem:[#allocation8 + $0x38] sm:$0xff] %v857_v40   ;;  %v670_v44 = vunpack.c.l.bf16 %v606_v51 }
 0x109   :  { %865 = vst [vmem:[#allocation7 + $0x38] sm:$0xff] %v817_v15   ;;  %v687_v2 = vmul.f32 %v671_v56, %v655_v32  ;;  %v654_v9 = vunpack.c.l.bf16 %v574_v36  ;;  %762 = dma.vmem_to_hbm [thread:$0]  %s755_s2, 1024, %s757_s7, [#allocation9], %s1069_s8, %s1069_s8, %s1070_s9  }
 0x10a   :  { %749 = dma.vmem_to_hbm [thread:$0]  %s742_s29, 1024, %s744_s27, [#allocation4], %s1069_s8, %s1069_s8, %s1070_s9  }
 0x10b   :  { %v686_v35 = vmul.f32 %v670_v44, %v654_v9 }
 0x10c   :  { %718 = vadd.xlane.f32.xlu2 %v687_v2 }
 0x10f   :  { %716 = vadd.xlane.f32.xlu1 %v686_v35 }
 0x13d   :  { %v689_v60 = vpop.xlane.xlu2 %688 }
 0x13e   :  { %721 = vst.msk [vmem:[%s2061_s4] sm:$0xff] %vm720_vm12, %v689_v60 }
 0x141   :  { %v691_v20 = vpop.xlane.xlu0 %690 }
 0x142   :  { %722 = vst.msk [vmem:[%s2061_s4 + $0x8] sm:$0xff] %vm720_vm12, %v691_v20 }
 0x14d   :  { %v695_v12 = vpop.xlane.xlu2 %694  ;;  %v697_v43 = vpop.xlane.xlu0 %696 }
 0x14e   :  { %724 = vst.msk [vmem:[%s2061_s4 + $0x18] sm:$0xff] %vm720_vm12, %v695_v12 }
 0x14f   :  { %725 = vst.msk [vmem:[%s2061_s4 + $0x20] sm:$0xff] %vm720_vm12, %v697_v43 }
 0x153   :  { %v693_v58 = vpop.xlane.xlu1 %692 }
 0x154   :  { %723 = vst.msk [vmem:[%s2061_s4 + $0x10] sm:$0xff] %vm720_vm12, %v693_v58 }
 0x15e   :  { %v703_v61 = vpop.xlane.xlu0 %702 }
 0x15f   :  { %728 = vst.msk [vmem:[%s2061_s4 + $0x38] sm:$0xff] %vm720_vm12, %v703_v61 }
 0x161   :  { %v701_v41 = vpop.xlane.xlu2 %700 }
 0x162   :  { %727 = vst.msk [vmem:[%s2061_s4 + $0x30] sm:$0xff] %vm720_vm12, %v701_v41 }
 0x163   :  { %v699_v17 = vpop.xlane.xlu1 %698 }
 0x164   :  { %726 = vst.msk [vmem:[%s2061_s4 + $0x28] sm:$0xff] %vm720_vm12, %v699_v17 }
 0x16d   :  { %v709_v3 = vpop.xlane.xlu0 %708 }
 0x16e   :  { %v707_v50 = vpop.xlane.xlu2 %706  ;;  %731 = vst.msk [vmem:[%s2061_s4 + $0x50] sm:$0xff] %vm720_vm12, %v709_v3 }
 0x16f   :  { %730 = vst.msk [vmem:[%s2061_s4 + $0x48] sm:$0xff] %vm720_vm12, %v707_v50 }
 0x172   :  { %v705_v59 = vpop.xlane.xlu1 %704 }
 0x173   :  { %729 = vst.msk [vmem:[%s2061_s4 + $0x40] sm:$0xff] %vm720_vm12, %v705_v59 }
 0x175   :  { %v715_v19 = vpop.xlane.xlu0 %714 }
 0x176   :  { %734 = vst.msk [vmem:[%s2061_s4 + $0x68] sm:$0xff] %vm720_vm12, %v715_v19 }
 0x177   :  { %v713_v62 = vpop.xlane.xlu2 %712 }
 0x178   :  { %733 = vst.msk [vmem:[%s2061_s4 + $0x60] sm:$0xff] %vm720_vm12, %v713_v62 }
 0x17a   :  { %v711_v39 = vpop.xlane.xlu1 %710 }
 0x17b   :  { %732 = vst.msk [vmem:[%s2061_s4 + $0x58] sm:$0xff] %vm720_vm12, %v711_v39 }
 0x17f   :  { %v719_v46 = vpop.xlane.xlu2 %718 }
 0x180   :  { %736 = vst.msk [vmem:[%s2061_s4 + $0x78] sm:$0xff] %vm720_vm12, %v719_v46 }
 0x182   :  { %v717_v6 = vpop.xlane.xlu1 %716 }
 0x183   :  { %735 = vst.msk [vmem:[%s2061_s4 + $0x70] sm:$0xff] %vm720_vm12, %v717_v6 }
 0x184   :  { %1059 = dma.done.wait [#allocation4], 1024  }
 0x185   :  { %1060 = vsyncadd [#allocation4], 4294966272 }
 0x186   :  { %1061 = dma.done.wait [#allocation9], 1024  }
 0x187   :  { %1062 = vsyncadd [#allocation9], 4294966272 }
 0x188   :  { %775 = vsyncpa [#allocation3], 1 }
 0x189   :  { %776 = vsyncpa [#allocation6], 1 }
 0x18a   :  { %777 = vsyncpa [#allocation4], 1 }
 0x18b   :  { %778 = vsyncpa [#allocation9], 1 }

</bundles_post_ra>
